<compile_context>
chip_gen: v6e
topology: v6e:2x2x1
jax: 0.10.0
libtpu: 0.0.40
codegen_flags: <defaults>
</compile_context>

<pallas_src>
import functools

import jax
import jax.numpy as jnp
from jax.experimental import pallas as pl
from jax.experimental.pallas import tpu as pltpu


def _categorical_kernel(x_ref, w_ref, b_ref, logp_ref, stats_ref):
    # logits = x @ W_t + b  (W_t is the pre-transposed [D, N] weight, so the
    # MXU contraction needs no in-kernel relayout of the RHS).
    logits = jnp.dot(
        x_ref[...], w_ref[...], preferred_element_type=jnp.float32
    ) + b_ref[...]

    # Numerically-stable log-softmax; reuse `shifted` instead of recomputing
    # logits - lse (saves a full-tile VPU subtract per block).
    m = jnp.max(logits, axis=-1, keepdims=True)
    shifted = logits - m
    e = jnp.exp(shifted)
    z = jnp.sum(e, axis=-1, keepdims=True)
    log_z = jnp.log(z)                       # exact: feeds log_probs / lse

    log_probs = shifted - log_z
    lse = m + log_z                          # raw logits = log_probs + lse
    # entropy = log Z - sum(e * shifted) / Z ; divide goes to the EUP slot.
    inv_z = pl.reciprocal(z, approx=True)
    ent = log_z - jnp.sum(e * shifted, axis=-1, keepdims=True) * inv_z

    logp_ref[...] = log_probs.astype(logp_ref.dtype)
    # Merged per-row stats block: column 0 = logsumexp, column 1 = entropy.
    stats_ref[...] = jnp.concatenate([lse, ent], axis=-1).astype(stats_ref.dtype)


def _select_tile(B, D, N, tile_b, vmem_budget_bytes):
    """Pick the batch tile: big (amortize grid-step overhead), multiple of 8,
    >=2 grid steps when B >= 16 (v7x megacore), and within the VMEM budget."""
    if B <= 8:
        return B                              # full-dim block is always legal
    tb = max(8, (min(tile_b, B) // 8) * 8)
    if B >= 16:
        half = max(8, (((B + 1) // 2) // 8) * 8)
        tb = min(tb, half)                    # guarantee >=2 grid steps (v7x)

    lane = 128
    pad = lambda n: -(-n // lane) * lane      # VMEM minor-dim padding
    resident = 4 * (D * pad(N) + pad(N))      # weight + bias (single-buffered)

    def budget(t):
        # double-buffered streaming blocks: x, log_probs, stats
        return resident + 2 * 4 * (t * pad(D) + t * pad(N) + t * pad(2))

    while tb > 8 and budget(tb) > vmem_budget_bytes:
        tb = max(8, ((tb // 2) // 8) * 8)
    return tb


@functools.partial(jax.jit, static_argnames=("tile_b",))
def categorical_forward(x, weight, bias, *, tile_b=4096):
    """Fused Linear + Categorical(logits=...) forward.

    Args:
      x:      [B, num_inputs]  float32
      weight: [num_outputs, num_inputs]  (native PyTorch nn.Linear layout)
      bias:   [num_outputs]

    Returns:
      log_probs: [B, N]  normalized logits (the distribution's canonical state)
      lse:       [B, 1]  logsumexp(logits, -1)   (raw logits = log_probs + lse)
      entropy:   [B, 1]  distribution entropy per row
    """
    B, D = x.shape
    N, D2 = weight.shape
    assert D2 == D

    # One-time transpose outside the kernel (strictly cheaper than a per-tile
    # RHS relayout inside every grid step).
    w_t = weight.T                            # [D, N]
    b2 = bias.reshape(1, N)                   # broadcast over sublanes

    vmem_limit = 32 * 1024 * 1024             # safe on v5e/v6e/v7x
    tb = _select_tile(B, D, N, tile_b, vmem_budget_bytes=24 * 1024 * 1024)
    grid = (pl.cdiv(B, tb),)

    log_probs, stats = pl.pallas_call(
        _categorical_kernel,
        out_shape=(
            jax.ShapeDtypeStruct((B, N), jnp.float32),
            jax.ShapeDtypeStruct((B, 2), jnp.float32),
        ),
        grid=grid,
        in_specs=[
            pl.BlockSpec((tb, D), lambda i: (i, 0)),        # x: streamed
            pl.BlockSpec((D, N), lambda i: (0, 0),          # weight: resident,
                         pipeline_mode=pl.Buffered(1)),     #   single buffer
            pl.BlockSpec((1, N), lambda i: (0, 0),          # bias: resident
                         pipeline_mode=pl.Buffered(1)),
        ],
        out_specs=(
            pl.BlockSpec((tb, N), lambda i: (i, 0)),        # log_probs
            pl.BlockSpec((tb, 2), lambda i: (i, 0)),        # [lse, entropy]
        ),
        compiler_params=pltpu.CompilerParams(
            dimension_semantics=("parallel",),   # 2 TCs on v7x; no-op v5e/v6e
            vmem_limit_bytes=vmem_limit,
        ),
    )(x, w_t, b2)

    lse = stats[:, 0:1]
    entropy = stats[:, 1:2]
    return log_probs, lse, entropy


def init_linear_params(key, num_inputs, num_outputs, gain=0.01):
    """Deterministic orthogonal init (gain=0.01) + zero bias, matching init_()."""
    w = jax.nn.initializers.orthogonal(scale=gain)(
        key, (num_outputs, num_inputs), jnp.float32)
    b = jnp.zeros((num_outputs,), jnp.float32)
    return w, b


def _reference(x, weight, bias):
    logits = x @ weight.T + bias
    lse = jax.nn.logsumexp(logits, axis=-1, keepdims=True)
    logp = logits - lse
    ent = -jnp.sum(jnp.exp(logp) * logp, axis=-1, keepdims=True)
    return logits, lse, logp, ent


if __name__ == "__main__":
    num_inputs, num_outputs = 32, 16
    key = jax.random.PRNGKey(0)
    kx, kw, kx2 = jax.random.split(key, 3)
    weight, bias = init_linear_params(kw, num_inputs, num_outputs)

    # Small shape consistent with the module (single-tile path).
    B = 8
    x = jax.random.normal(kx, (B, num_inputs), jnp.float32)
    log_probs, lse, entropy = categorical_forward(x, weight, bias)
    jax.block_until_ready((log_probs, lse, entropy))

    ref_logits, ref_lse, ref_logp, ref_ent = _reference(x, weight, bias)
    assert jnp.allclose(log_probs, ref_logp, atol=1e-5, rtol=1e-5)
    assert jnp.allclose(lse, ref_lse, atol=1e-5, rtol=1e-5)
    # entropy uses the EUP approx reciprocal -> slightly looser tolerance
    assert jnp.allclose(entropy, ref_ent, atol=5e-3, rtol=1e-3)
    assert jnp.allclose(log_probs + lse, ref_logits, atol=1e-5, rtol=1e-5)

    # Larger batch to exercise the multi-step pipelined grid (>=2 steps),
    # the resident Buffered(1) weight/bias, and the merged stats output.
    B2 = 1024
    x2 = jax.random.normal(kx2, (B2, num_inputs), jnp.float32)
    log_probs2, lse2, entropy2 = categorical_forward(x2, weight, bias)
    jax.block_until_ready((log_probs2, lse2, entropy2))

    ref_logits2, ref_lse2, ref_logp2, ref_ent2 = _reference(x2, weight, bias)
    assert jnp.allclose(log_probs2, ref_logp2, atol=1e-5, rtol=1e-5)
    assert jnp.allclose(lse2, ref_lse2, atol=1e-5, rtol=1e-5)
    assert jnp.allclose(entropy2, ref_ent2, atol=5e-3, rtol=1e-3)
    assert jnp.allclose(log_probs2 + lse2, ref_logits2, atol=1e-5, rtol=1e-5)

    # TODO(synk): sampling methods (sample / gumble_sample / gumbel_softmax /
    # softmax_sample, WeightedRandomSampler) and log_probs(action)/CrossEntropy
    # are stochastic / training-time torch.distributions utilities outside the
    # forward pass; not kernelized here.
    print("KERNEL_OK")
</pallas_src>

<mosaic_0001>
module attributes {stable_mosaic.version = 11 : i64} {
  func.func @_categorical_kernel(%arg0: i32, %arg1: memref<8x32xf32, #tpu.memory_space<vmem>>, %arg2: memref<32x16xf32, #tpu.memory_space<vmem>>, %arg3: memref<1x16xf32, #tpu.memory_space<vmem>>, %arg4: memref<8x16xf32, #tpu.memory_space<vmem>>, %arg5: memref<8x2xf32, #tpu.memory_space<vmem>>) attributes {dimension_semantics = [#tpu.dimension_semantics<parallel>], iteration_bounds = array<i64: 1>, scalar_prefetch = 0 : i64, scratch_operands = 0 : i64, tpu.core_type = #tpu.core_type<tc>, window_params = [{transform_indices = @transform_0, window_bounds = array<i64: 8, 32>}, {pipeline_mode = #tpu.pipeline_mode<synchronous>, transform_indices = @transform_1, window_bounds = array<i64: 32, 16>}, {pipeline_mode = #tpu.pipeline_mode<synchronous>, transform_indices = @transform_2, window_bounds = array<i64: 1, 16>}, {transform_indices = @transform_3, window_bounds = array<i64: 8, 16>}, {transform_indices = @transform_4, window_bounds = array<i64: 8, 2>}]} {
    %c0 = arith.constant 0 : index
    %c0_0 = arith.constant 0 : index
    %0 = vector.load %arg1[%c0, %c0_0] : memref<8x32xf32, #tpu.memory_space<vmem>>, vector<8x32xf32>
    %c0_1 = arith.constant 0 : index
    %c0_2 = arith.constant 0 : index
    %1 = vector.load %arg2[%c0_1, %c0_2] : memref<32x16xf32, #tpu.memory_space<vmem>>, vector<32x16xf32>
    %cst = arith.constant dense<0.000000e+00> : vector<8x16xf32>
    %2 = tpu.matmul %0, %1, %cst {dimension_numbers = #tpu.dot_dimension_numbers<[1], [0], [0], [1], [0, 0, 1, 1], [], []>} : vector<8x32xf32>, vector<32x16xf32>, vector<8x16xf32> -> vector<8x16xf32>
    %c0_3 = arith.constant 0 : index
    %c0_4 = arith.constant 0 : index
    %3 = vector.load %arg3[%c0_3, %c0_4] : memref<1x16xf32, #tpu.memory_space<vmem>>, vector<1x16xf32>
    %4 = vector.broadcast %3 : vector<1x16xf32> to vector<8x16xf32>
    %5 = arith.addf %2, %4 : vector<8x16xf32>
    %cst_5 = arith.constant dense<0xFF800000> : vector<8xf32>
    %6 = vector.multi_reduction <maximumf>, %5, %cst_5 [1] : vector<8x16xf32> to vector<8xf32>
    %7 = vector.shape_cast %6 : vector<8xf32> to vector<8x1xf32>
    %8 = vector.broadcast %7 : vector<8x1xf32> to vector<8x16xf32>
    %9 = arith.subf %5, %8 : vector<8x16xf32>
    %10 = math.exp %9 : vector<8x16xf32>
    %cst_6 = arith.constant dense<0.000000e+00> : vector<8xf32>
    %11 = vector.multi_reduction <add>, %10, %cst_6 [1] : vector<8x16xf32> to vector<8xf32>
    %12 = vector.shape_cast %11 : vector<8xf32> to vector<8x1xf32>
    %13 = math.log %12 : vector<8x1xf32>
    %14 = vector.broadcast %13 : vector<8x1xf32> to vector<8x16xf32>
    %15 = arith.subf %9, %14 : vector<8x16xf32>
    %16 = arith.addf %7, %13 : vector<8x1xf32>
    %17 = tpu.reciprocal %12 {approx = true} : vector<8x1xf32> -> vector<8x1xf32>
    %18 = arith.mulf %10, %9 : vector<8x16xf32>
    %cst_7 = arith.constant dense<0.000000e+00> : vector<8xf32>
    %19 = vector.multi_reduction <add>, %18, %cst_7 [1] : vector<8x16xf32> to vector<8xf32>
    %20 = vector.shape_cast %19 : vector<8xf32> to vector<8x1xf32>
    %21 = arith.mulf %20, %17 : vector<8x1xf32>
    %22 = arith.subf %13, %21 : vector<8x1xf32>
    %c0_8 = arith.constant 0 : index
    %c0_9 = arith.constant 0 : index
    %23 = vector.load %arg4[%c0_8, %c0_9] : memref<8x16xf32, #tpu.memory_space<vmem>>, vector<8x16xf32>
    tpu.vector_store %arg4[%c0_8, %c0_9], %15 {strides = array<i32>} : memref<8x16xf32, #tpu.memory_space<vmem>>, vector<8x16xf32>,
    %24 = tpu.concatenate %16, %22 in 1 : vector<8x1xf32>, vector<8x1xf32> -> vector<8x2xf32>
    %c0_10 = arith.constant 0 : index
    %c0_11 = arith.constant 0 : index
    %25 = vector.load %arg5[%c0_10, %c0_11] : memref<8x2xf32, #tpu.memory_space<vmem>>, vector<8x2xf32>
    tpu.vector_store %arg5[%c0_10, %c0_11], %24 {strides = array<i32>} : memref<8x2xf32, #tpu.memory_space<vmem>>, vector<8x2xf32>,
    return
  }
  func.func @transform_0(%arg0: i32) -> (i32, i32) {
    %c0_i32 = arith.constant 0 : i32
    %c0_i32_0 = arith.constant 0 : i32
    return %arg0, %c0_i32 : i32, i32
  }
  func.func @transform_1(%arg0: i32) -> (i32, i32) {
    %c0_i32 = arith.constant 0 : i32
    %c0_i32_0 = arith.constant 0 : i32
    %c0_i32_1 = arith.constant 0 : i32
    return %c0_i32, %c0_i32_0 : i32, i32
  }
  func.func @transform_2(%arg0: i32) -> (i32, i32) {
    %c0_i32 = arith.constant 0 : i32
    %c0_i32_0 = arith.constant 0 : i32
    %c0_i32_1 = arith.constant 0 : i32
    return %c0_i32, %c0_i32_0 : i32, i32
  }
  func.func @transform_3(%arg0: i32) -> (i32, i32) {
    %c0_i32 = arith.constant 0 : i32
    %c0_i32_0 = arith.constant 0 : i32
    return %arg0, %c0_i32 : i32, i32
  }
  func.func @transform_4(%arg0: i32) -> (i32, i32) {
    %c0_i32 = arith.constant 0 : i32
    %c0_i32_0 = arith.constant 0 : i32
    return %arg0, %c0_i32 : i32, i32
  }
}

</mosaic_0001>

<bundles_post_ra>
// kernel: categorical_forward.1
= control target key start
LH: loop header
LB: loop body
LE: loop exit
PB: predicated region body
PF: predicated region fallthrough
CT: control target
= control target key end

     0   :  { %v196_v1 = vmov 0.0   ;;  %vm197_vm0 = vmmov 0   ;;  %s252_s0 = inlined_call_operand.vmem [shape: f32[8,32], index: 0, kind: input, shape index: {}]   ;;  %s253_s1 = inlined_call_operand.vmem [shape: f32[32,16], index: 1, kind: input, shape index: {}]   ;;  %s254_s2 = inlined_call_operand.vmem [shape: f32[1,16], index: 2, kind: input, shape index: {}]   ;;  %s255_s3 = inlined_call_operand.hbm [shape: f32[8,16], index: 3, kind: output, shape index: {0}]   ;;  %s256_s4 = inlined_call_operand.vmem [shape: f32[8,2], index: 4, kind: output, shape index: {1}]  }
   0x1   :  { %v21_v0 = vld [vmem:[%s253_s1 + $0x18] sm:$0xff]  ;;  %154 = vmatprep.subr.mxu0 %v196_v1  ;;  %v20_v2 = vld [vmem:[%s253_s1 + $0x10] sm:$0xff]  ;;  %162 = vmatprep.mubr.msk.f32.mxu0 %vm197_vm0, %v196_v1 }
   0x2   :  { %155 = vmatpush3.msra.mxu0 %v21_v0 }
   0x3   :  { %10 = vsyncpa [#allocation3], 0  ;;  %156 = vmatprep.subr.mxu0 %v196_v1  ;;  %v19_v3 = vld [vmem:[%s253_s1 + $0x8] sm:$0xff]  ;;  %v18_v4 = vld [vmem:[%s253_s1] sm:$0xff]  ;;  %vm29_vm1 = vcmask 261120   ;;  %vm103_vm2 = vcmask 130048  }
   0x4   :  { %157 = vmatpush3.msra.mxu0 %v20_v2  ;;  %v17_v5 = vld [vmem:[%s252_s0] sm:$0xff]  ;;  %s198_s0 = smov [#allocation2]   ;;  %vm125_vm3 = vcmask 7168   ;;  %vm127_vm4 = vcmask 15360  }
   0x5   :  { %158 = vmatprep.subr.mxu0 %v196_v1  ;;  %v147_v6 = vld [vmem:[%s254_s2] ss:$0 sm:$0xff]  ;;  %s135_s1 = sshll.u32 %s198_s0, 4  ;;  %s136_s1 = int_to_ptr.vmem [resolvable:$true] %s135_s1 }
   0x6   :  { %159 = vmatpush3.msra.mxu0 %v19_v3  ;;  %s174_s2 = scalar_lea.vmem %s136_s1, 128  ;;  %p179_p1 = scmp.lt.s32.totalorder %s136_s1, %s136_s1 }
   0x7   :  { %160 = vmatprep.subr.mxu0 %v196_v1  ;;  %p175_p0 = scmp.ne.s32.totalorder %s136_s1, %s174_s2  ;;  %p180_p2 = scmp.lt.s32.totalorder %s174_s2, %s174_s2 }
   0x8   :  { %161 = vmatpush3.msra.mxu0 %v18_v4 }
   0x9   :  { %163 = vmatmul.mubr.msk.f32.vlgmr.msra.gmra.mxu0 %vm29_vm1, %v17_v5  ;;  %p181_p3 = por %p180_p2, %p179_p1 }
   0xb   :  { %p182_p4 = pnand %p181_p3, %p175_p0 }
  0xc9   :  { %v99_v7 = vpop.f32.mrf.mxu0 }
  0xca   :  { %v100_v8 = vadd.f32 %v147_v6, %v99_v7 }
  0xcb   :  { %v164_v9 = vpop.f32.mrf.mxu0 }
  0xcc   :  { %v104_v10 = vsel %vm103_vm2, %v100_v8, -inf }
  0xcd   :  { %105 = vmax.xlane.f32.xlu0 %v104_v10 }
 0x156   :  { %v106_v11 = vpop.xlane.xlu0 %105 }
 0x157   :  { %v107_v12 = vsub.f32 %v100_v8, %v106_v11 }
 0x159   :  { %v108_v13 = vmul.f32 1.442695, %v107_v12 }
 0x15b   :  { %168 = vpow2.f32 %v108_v13 }
 0x168   :  { %v169_v14 = vpop.eup %168 }
 0x169   :  { %v110_v15 = vsel %vm103_vm2, %v169_v14, 0.0  ;;  %v118_v16 = vmul.f32 %v169_v14, %v107_v12 }
 0x16a   :  { %111 = vadd.xlane.f32.xlu0 %v110_v15 }
 0x16b   :  { %v119_v17 = vsel %vm103_vm2, %v118_v16, 0.0 }
 0x16c   :  { %120 = vadd.xlane.f32.xlu1 %v119_v17 }
 0x1f3   :  { %v112_v18 = vpop.xlane.xlu0 %111 }
 0x1f4   :  { %170 = vlog2.f32 %v112_v18 }
 0x1f5   :  { %172 = vrcp.f32 %v112_v18  ;;  %v121_v22 = vpop.xlane.xlu1 %120 }
 0x201   :  { %v171_v19 = vpop.eup %170 }
 0x202   :  { %v173_v20 = vpop.eup %172  ;;  %v114_v21 = vmul.f32 0.6931472, %v171_v19 }
 0x203   :  { %v122_v23 = vmul.f32 %v173_v20, %v121_v22 }
 0x204   :  { %v116_v24 = vadd.f32 %v114_v21, %v106_v11  ;;  %v115_v25 = vsub.f32 %v107_v12, %v114_v21 }
 0x205   :  { %v123_v26 = vsub.f32 %v114_v21, %v122_v23 }
 0x206   :  { %124 = vst.msk [vmem:[#allocation2] sm:$0xff] %vm103_vm2, %v115_v25 }
 0x207   :  { %v126_v27 = vsel %vm125_vm3, %v116_v24, %v123_v26 }
 0x208   :  { %185 = shalt.err (!%p182_p4)
}
 0x209   :  { %138 = dma.vmem_to_hbm [thread:$0]  %s136_s1, 128, %s255_s3, [#allocation3]   ;;  %128 = vst.msk [vmem:[%s256_s4] sm:$0xff] %vm127_vm4, %v126_v27 }
 0x20a   :  { %194 = dma.done.wait [#allocation3], 128  }
 0x20b   :  { %195 = vsyncadd [#allocation3], 4294967168 }
 0x20c   :  { %146 = vsyncpa [#allocation3], 1 }

</bundles_post_ra>
